<compile_context>
chip_gen: v6e
topology: v6e:2x2x1
jax: 0.10.0
libtpu: 0.0.40
codegen_flags: <defaults>
</compile_context>

<pallas_src>
import math

import jax
import jax.numpy as jnp
from jax import lax
from jax.experimental import pallas as pl
from jax.experimental.pallas import tpu as pltpu


# ----------------------------------------------------------------------------
# Pallas kernels
# ----------------------------------------------------------------------------
def _mm_affine_relu_kernel(x_ref, w_ref, s_ref, b_ref, o_ref, acc_ref):
    """o = relu((x @ w) * s + b), accumulated over the K grid axis."""

    @pl.when(pl.program_id(1) == 0)
    def _():
        acc_ref[...] = jnp.zeros_like(acc_ref)

    acc_ref[...] += jnp.dot(
        x_ref[...],
        w_ref[...],
        preferred_element_type=jnp.float32,
        precision=lax.Precision.HIGHEST,
    )

    @pl.when(pl.program_id(1) == pl.num_programs(1) - 1)
    def _():
        y = acc_ref[...] * s_ref[...] + b_ref[...]
        o_ref[...] = jnp.maximum(y, 0.0).astype(o_ref.dtype)


def _mul_affine_relu_kernel(x_ref, st_ref, s_ref, b_ref, o_ref):
    """o = relu(x * st * s + b)  (st varies per batch; s/b per channel)."""
    y = x_ref[...] * st_ref[...] * s_ref[...] + b_ref[...]
    o_ref[...] = jnp.maximum(y, 0.0).astype(o_ref.dtype)


# ----------------------------------------------------------------------------
# Kernel wrappers
# ----------------------------------------------------------------------------
def _pick_block(dim, max_block, mult):
    """Largest divisor of `dim` that is a multiple of `mult` and <= max_block,
    falling back to the full dimension (always a legal BlockSpec size)."""
    if dim <= max_block:
        return dim
    t = (max_block // mult) * mult
    while t >= mult:
        if dim % t == 0:
            return t
        t -= mult
    return dim


def mm_affine_relu(x, w, scale, shift, *, max_rows=512, max_k=512):
    """relu((x @ w) * scale + shift); x:(M,K), w:(K,N), scale/shift:(N,)."""
    M, K = x.shape
    K2, N = w.shape
    assert K == K2
    tm = _pick_block(M, max_rows, 8)     # sublane-aligned row tile
    tk = _pick_block(K, max_k, 128)      # lane-aligned K tile (or full K)
    grid = (M // tm, K // tk)

    return pl.pallas_call(
        _mm_affine_relu_kernel,
        out_shape=jax.ShapeDtypeStruct((M, N), x.dtype),
        grid_spec=pltpu.PrefetchScalarGridSpec(
            num_scalar_prefetch=0,
            grid=grid,
            in_specs=[
                pl.BlockSpec((tm, tk), lambda i, k: (i, k)),
                pl.BlockSpec((tk, N), lambda i, k: (k, 0)),
                pl.BlockSpec((1, N), lambda i, k: (0, 0)),
                pl.BlockSpec((1, N), lambda i, k: (0, 0)),
            ],
            out_specs=pl.BlockSpec((tm, N), lambda i, k: (i, 0)),
            scratch_shapes=[pltpu.VMEM((tm, N), jnp.float32)],
        ),
        compiler_params=pltpu.CompilerParams(
            dimension_semantics=("parallel", "arbitrary")
        ),
    )(x, w, scale.reshape(1, N), shift.reshape(1, N))


def mul_state_affine_relu(f_nhwc, state, scale, shift, *, max_rows=2048):
    """relu(f * state[n,c] * scale[c] + shift[c])  -- the norm_layer(f5*state)."""
    N, H, W, C = f_nhwc.shape
    HW = H * W
    thw = _pick_block(HW, max_rows, 8)
    grid = (N, HW // thw)
    out = pl.pallas_call(
        _mul_affine_relu_kernel,
        out_shape=jax.ShapeDtypeStruct((N, HW, C), f_nhwc.dtype),
        grid_spec=pltpu.PrefetchScalarGridSpec(
            num_scalar_prefetch=0,
            grid=grid,
            in_specs=[
                pl.BlockSpec((1, thw, C), lambda n, i: (n, i, 0)),
                pl.BlockSpec((1, 1, C), lambda n, i: (n, 0, 0)),
                pl.BlockSpec((1, 1, C), lambda n, i: (0, 0, 0)),
                pl.BlockSpec((1, 1, C), lambda n, i: (0, 0, 0)),
            ],
            out_specs=pl.BlockSpec((1, thw, C), lambda n, i: (n, i, 0)),
        ),
        compiler_params=pltpu.CompilerParams(
            dimension_semantics=("parallel", "parallel")
        ),
    )(
        f_nhwc.reshape(N, HW, C),
        state.reshape(N, 1, C),
        scale.reshape(1, 1, C),
        shift.reshape(1, 1, C),
    )
    return out.reshape(N, H, W, C)


# ----------------------------------------------------------------------------
# Layer helpers (wrapper glue feeding the fused Pallas kernels)
# ----------------------------------------------------------------------------
def _im2col_3x3(x_nhwc):
    """3x3 / stride 1 / pad 1 patches -> (N*H*W, 9*C), matching HWIO reshape."""
    N, H, W, C = x_nhwc.shape
    xp = jnp.pad(x_nhwc, ((0, 0), (1, 1), (1, 1), (0, 0)))
    cols = [xp[:, dh:dh + H, dw:dw + W, :] for dh in range(3) for dw in range(3)]
    return jnp.concatenate(cols, axis=-1).reshape(N * H * W, 9 * C)


def conv1x1_bn_relu(x_nhwc, p):
    N, H, W, C = x_nhwc.shape
    cout = p["w"].shape[-1]
    y = mm_affine_relu(
        x_nhwc.reshape(N * H * W, C), p["w"].reshape(C, cout), p["scale"], p["shift"]
    )
    return y.reshape(N, H, W, cout)


def conv3x3_bn_relu(x_nhwc, p):
    N, H, W, C = x_nhwc.shape
    cout = p["w"].shape[-1]
    y = mm_affine_relu(
        _im2col_3x3(x_nhwc), p["w"].reshape(9 * C, cout), p["scale"], p["shift"]
    )
    return y.reshape(N, H, W, cout)


def _coord_feat(N, H, W, dtype):
    """torch.linspace(-1,1) x/y coordinate channels, channel order [x, y]."""
    xs = jnp.linspace(-1.0, 1.0, W, dtype=dtype)
    ys = jnp.linspace(-1.0, 1.0, H, dtype=dtype)
    x = jnp.broadcast_to(xs[None, :], (H, W))
    y = jnp.broadcast_to(ys[:, None], (H, W))
    coord = jnp.stack([x, y], axis=-1)
    return jnp.broadcast_to(coord[None], (N, H, W, 2))


# ----------------------------------------------------------------------------
# FPN forward (Pallas path)
# ----------------------------------------------------------------------------
def fpn_forward(v3, v4, v5, state, params):
    to_nhwc = lambda t: jnp.transpose(t, (0, 2, 3, 1))
    v3n, v4n, v5n = to_nhwc(v3), to_nhwc(v4), to_nhwc(v5)
    N, H, W, _ = v3n.shape

    # state = txt_proj(state)[..., None, None]
    pt = params["txt_proj"]
    txt = mm_affine_relu(state, pt["w"], pt["scale"], pt["shift"])          # (N, C5)

    # f5 = norm_layer(f1_v_proj(v5) * state)
    f5a = conv1x1_bn_relu(v5n, params["f1_v_proj"])
    f5 = mul_state_affine_relu(
        f5a, txt, params["norm_layer"]["scale"], params["norm_layer"]["shift"]
    )

    # f4 = f2_cat(cat([f2_v_proj(v4), f5]))
    f4a = conv3x3_bn_relu(v4n, params["f2_v_proj"])
    f4 = conv1x1_bn_relu(jnp.concatenate([f4a, f5], axis=-1), params["f2_cat"])

    # f3 = f3_cat(cat([f3_v_proj(v3), f4]))
    f3a = conv3x3_bn_relu(v3n, params["f3_v_proj"])
    f3 = conv1x1_bn_relu(jnp.concatenate([f3a, f4], axis=-1), params["f3_cat"])

    # fq = aggr(cat([fq3, fq4, fq5]))
    fq5 = conv3x3_bn_relu(f5, params["f4_proj5"])
    fq4 = conv3x3_bn_relu(f4, params["f4_proj4"])
    fq3 = conv3x3_bn_relu(f3, params["f4_proj3"])
    fq = conv1x1_bn_relu(jnp.concatenate([fq3, fq4, fq5], axis=-1), params["aggr"])

    # coordconv: CoordConv(3x3) then conv_layer(3x3)
    coord = _coord_feat(N, H, W, fq.dtype)
    fq = conv3x3_bn_relu(jnp.concatenate([fq, coord], axis=-1), params["coord1"])
    fq = conv3x3_bn_relu(fq, params["coord2"])

    return jnp.transpose(fq, (0, 3, 1, 2))   # back to NCHW


# ----------------------------------------------------------------------------
# Parameter init (folded BN: scale/shift) and pure-JAX reference
# ----------------------------------------------------------------------------
def _init_conv(key, ksize, cin, cout):
    kw_, ks, kb = jax.random.split(key, 3)
    w = jax.random.normal(kw_, (ksize, ksize, cin, cout), jnp.float32)
    w = w / math.sqrt(ksize * ksize * cin)
    scale = 1.0 + 0.1 * jax.random.normal(ks, (cout,), jnp.float32)
    shift = 0.1 * jax.random.normal(kb, (cout,), jnp.float32)
    return {"w": w, "scale": scale, "shift": shift}


def _init_linear(key, cin, cout):
    kw_, ks, kb = jax.random.split(key, 3)
    w = jax.random.normal(kw_, (cin, cout), jnp.float32) / math.sqrt(cin)
    scale = 1.0 + 0.1 * jax.random.normal(ks, (cout,), jnp.float32)
    shift = 0.1 * jax.random.normal(kb, (cout,), jnp.float32)
    return {"w": w, "scale": scale, "shift": shift}


def init_params(key, in_channels, out_channels):
    ks = jax.random.split(key, 14)
    c3i, c4i, c5i = in_channels
    c3o, c4o, c5o = out_channels
    return {
        "txt_proj": _init_linear(ks[0], c5i, c5o),
        "f1_v_proj": _init_conv(ks[1], 1, c5i, c5o),
        "norm_layer": {
            "scale": 1.0 + 0.1 * jax.random.normal(ks[2], (c5o,), jnp.float32),
            "shift": 0.1 * jax.random.normal(ks[3], (c5o,), jnp.float32),
        },
        "f2_v_proj": _init_conv(ks[4], 3, c4i, c4o),
        "f2_cat": _init_conv(ks[5], 1, c4o + c5o, c4o),
        "f3_v_proj": _init_conv(ks[6], 3, c3i, c3o),
        "f3_cat": _init_conv(ks[7], 1, c3o + c4o, c4o),
        "f4_proj5": _init_conv(ks[8], 3, c5o, c4o),
        "f4_proj4": _init_conv(ks[9], 3, c4o, c4o),
        "f4_proj3": _init_conv(ks[10], 3, c4o, c4o),
        "aggr": _init_conv(ks[11], 1, 3 * c4o, c4o),
        "coord1": _init_conv(ks[12], 3, c4o + 2, c4o),
        "coord2": _init_conv(ks[13], 3, c4o, c4o),
    }


def _conv_bn_relu_ref(x_nhwc, p):
    y = lax.conv_general_dilated(
        x_nhwc, p["w"], window_strides=(1, 1), padding="SAME",
        dimension_numbers=("NHWC", "HWIO", "NHWC"),
        precision=lax.Precision.HIGHEST,
    )
    return jnp.maximum(y * p["scale"] + p["shift"], 0.0)


def fpn_forward_ref(v3, v4, v5, state, params):
    to_nhwc = lambda t: jnp.transpose(t, (0, 2, 3, 1))
    v3n, v4n, v5n = to_nhwc(v3), to_nhwc(v4), to_nhwc(v5)
    N, H, W, _ = v3n.shape

    pt = params["txt_proj"]
    txt = jnp.maximum(
        jnp.dot(state, pt["w"], precision=lax.Precision.HIGHEST) * pt["scale"]
        + pt["shift"], 0.0)

    f5a = _conv_bn_relu_ref(v5n, params["f1_v_proj"])
    nl = params["norm_layer"]
    f5 = jnp.maximum(f5a * txt[:, None, None, :] * nl["scale"] + nl["shift"], 0.0)

    f4a = _conv_bn_relu_ref(v4n, params["f2_v_proj"])
    f4 = _conv_bn_relu_ref(jnp.concatenate([f4a, f5], -1), params["f2_cat"])

    f3a = _conv_bn_relu_ref(v3n, params["f3_v_proj"])
    f3 = _conv_bn_relu_ref(jnp.concatenate([f3a, f4], -1), params["f3_cat"])

    fq5 = _conv_bn_relu_ref(f5, params["f4_proj5"])
    fq4 = _conv_bn_relu_ref(f4, params["f4_proj4"])
    fq3 = _conv_bn_relu_ref(f3, params["f4_proj3"])
    fq = _conv_bn_relu_ref(jnp.concatenate([fq3, fq4, fq5], -1), params["aggr"])

    coord = _coord_feat(N, H, W, fq.dtype)
    fq = _conv_bn_relu_ref(jnp.concatenate([fq, coord], -1), params["coord1"])
    fq = _conv_bn_relu_ref(fq, params["coord2"])
    return jnp.transpose(fq, (0, 3, 1, 2))


# ----------------------------------------------------------------------------
if __name__ == "__main__":
    key = jax.random.PRNGKey(0)
    B, H, W = 2, 16, 16
    in_channels = [24, 24, 24]     # small stand-ins for [768, 768, 768]
    out_channels = [8, 16, 32]     # small stand-ins for [256, 512, 1024]

    k_v3, k_v4, k_v5, k_state, k_params = jax.random.split(key, 5)
    v3 = jax.random.normal(k_v3, (B, in_channels[0], H, W), jnp.float32)
    v4 = jax.random.normal(k_v4, (B, in_channels[1], H, W), jnp.float32)
    v5 = jax.random.normal(k_v5, (B, in_channels[2], H, W), jnp.float32)
    state = jax.random.normal(k_state, (B, in_channels[2]), jnp.float32)
    params = init_params(k_params, in_channels, out_channels)

    out = fpn_forward(v3, v4, v5, state, params)
    out = jax.block_until_ready(out)

    ref = fpn_forward_ref(v3, v4, v5, state, params)
    assert out.shape == (B, out_channels[1], H, W), out.shape
    err = float(jnp.max(jnp.abs(out - ref)))
    assert err < 5e-3, f"max abs error {err}"

    print("KERNEL_OK")
</pallas_src>

<mosaic_0001>
module attributes {stable_mosaic.version = 11 : i64} {
  func.func @_mm_affine_relu_kernel(%arg0: i32, %arg1: i32, %arg2: memref<2x24xf32, #tpu.memory_space<vmem>>, %arg3: memref<24x32xf32, #tpu.memory_space<vmem>>, %arg4: memref<1x32xf32, #tpu.memory_space<vmem>>, %arg5: memref<1x32xf32, #tpu.memory_space<vmem>>, %arg6: memref<2x32xf32, #tpu.memory_space<vmem>>, %arg7: memref<2x32xf32, #tpu.memory_space<vmem>>) attributes {dimension_semantics = [#tpu.dimension_semantics<parallel>, #tpu.dimension_semantics<arbitrary>], iteration_bounds = array<i64: 1, 1>, scalar_prefetch = 0 : i64, scratch_operands = 1 : i64, tpu.core_type = #tpu.core_type<tc>, window_params = [{transform_indices = @transform_0, window_bounds = array<i64: 2, 24>}, {transform_indices = @transform_1, window_bounds = array<i64: 24, 32>}, {pipeline_mode = #tpu.pipeline_mode<synchronous>, transform_indices = @transform_2, window_bounds = array<i64: 1, 32>}, {pipeline_mode = #tpu.pipeline_mode<synchronous>, transform_indices = @transform_3, window_bounds = array<i64: 1, 32>}, {transform_indices = @transform_4, window_bounds = array<i64: 2, 32>}]} {
    %c0_i32 = arith.constant 0 : i32
    %0 = arith.cmpi eq, %arg1, %c0_i32 : i32
    %1 = arith.extui %0 : i1 to i32
    %c0_i32_0 = arith.constant 0 : i32
    %2 = arith.cmpi ne, %1, %c0_i32_0 : i32
    scf.if %2 {
      %cst_10 = arith.constant 0.000000e+00 : f32
      %12 = vector.broadcast %cst_10 : f32 to vector<2x32xf32>
      %c0_11 = arith.constant 0 : index
      %c0_12 = arith.constant 0 : index
      %13 = vector.load %arg7[%c0_11, %c0_12] : memref<2x32xf32, #tpu.memory_space<vmem>>, vector<2x32xf32>
      tpu.vector_store %arg7[%c0_11, %c0_12], %12 {strides = array<i32>} : memref<2x32xf32, #tpu.memory_space<vmem>>, vector<2x32xf32>,
    } else {
    }
    %c0 = arith.constant 0 : index
    %c0_1 = arith.constant 0 : index
    %3 = vector.load %arg7[%c0, %c0_1] : memref<2x32xf32, #tpu.memory_space<vmem>>, vector<2x32xf32>
    %c0_2 = arith.constant 0 : index
    %c0_3 = arith.constant 0 : index
    %4 = vector.load %arg2[%c0_2, %c0_3] : memref<2x24xf32, #tpu.memory_space<vmem>>, vector<2x24xf32>
    %c0_4 = arith.constant 0 : index
    %c0_5 = arith.constant 0 : index
    %5 = vector.load %arg3[%c0_4, %c0_5] : memref<24x32xf32, #tpu.memory_space<vmem>>, vector<24x32xf32>
    %cst = arith.constant dense<0.000000e+00> : vector<2x32xf32>
    %6 = tpu.matmul %4, %5, %cst {dimension_numbers = #tpu.dot_dimension_numbers<[1], [0], [0], [1], [0, 0, 1, 1], [], []>, precision = #tpu.contract_precision<fp32>} : vector<2x24xf32>, vector<24x32xf32>, vector<2x32xf32> -> vector<2x32xf32>
    %7 = arith.addf %3, %6 : vector<2x32xf32>
    %c0_6 = arith.constant 0 : index
    %c0_7 = arith.constant 0 : index
    %8 = vector.load %arg7[%c0_6, %c0_7] : memref<2x32xf32, #tpu.memory_space<vmem>>, vector<2x32xf32>
    tpu.vector_store %arg7[%c0_6, %c0_7], %7 {strides = array<i32>} : memref<2x32xf32, #tpu.memory_space<vmem>>, vector<2x32xf32>,
    %c0_i32_8 = arith.constant 0 : i32
    %9 = arith.cmpi eq, %arg1, %c0_i32_8 : i32
    %10 = arith.extui %9 : i1 to i32
    %c0_i32_9 = arith.constant 0 : i32
    %11 = arith.cmpi ne, %10, %c0_i32_9 : i32
    scf.if %11 {
      %c0_10 = arith.constant 0 : index
      %c0_11 = arith.constant 0 : index
      %12 = vector.load %arg7[%c0_10, %c0_11] : memref<2x32xf32, #tpu.memory_space<vmem>>, vector<2x32xf32>
      %c0_12 = arith.constant 0 : index
      %c0_13 = arith.constant 0 : index
      %13 = vector.load %arg4[%c0_12, %c0_13] : memref<1x32xf32, #tpu.memory_space<vmem>>, vector<1x32xf32>
      %14 = vector.broadcast %13 : vector<1x32xf32> to vector<2x32xf32>
      %15 = arith.mulf %12, %14 : vector<2x32xf32>
      %c0_14 = arith.constant 0 : index
      %c0_15 = arith.constant 0 : index
      %16 = vector.load %arg5[%c0_14, %c0_15] : memref<1x32xf32, #tpu.memory_space<vmem>>, vector<1x32xf32>
      %17 = vector.broadcast %16 : vector<1x32xf32> to vector<2x32xf32>
      %18 = arith.addf %15, %17 : vector<2x32xf32>
      %cst_16 = arith.constant 0.000000e+00 : f32
      %19 = vector.broadcast %cst_16 : f32 to vector<2x32xf32>
      %20 = arith.maximumf %18, %19 : vector<2x32xf32>
      %c0_17 = arith.constant 0 : index
      %c0_18 = arith.constant 0 : index
      %21 = vector.load %arg6[%c0_17, %c0_18] : memref<2x32xf32, #tpu.memory_space<vmem>>, vector<2x32xf32>
      tpu.vector_store %arg6[%c0_17, %c0_18], %20 {strides = array<i32>} : memref<2x32xf32, #tpu.memory_space<vmem>>, vector<2x32xf32>,
    } else {
    }
    return
  }
  func.func @transform_0(%arg0: i32, %arg1: i32) -> (i32, i32) {
    %c0_i32 = arith.constant 0 : i32
    return %arg0, %arg1 : i32, i32
  }
  func.func @transform_1(%arg0: i32, %arg1: i32) -> (i32, i32) {
    %c0_i32 = arith.constant 0 : i32
    %c0_i32_0 = arith.constant 0 : i32
    return %arg1, %c0_i32 : i32, i32
  }
  func.func @transform_2(%arg0: i32, %arg1: i32) -> (i32, i32) {
    %c0_i32 = arith.constant 0 : i32
    %c0_i32_0 = arith.constant 0 : i32
    %c0_i32_1 = arith.constant 0 : i32
    return %c0_i32, %c0_i32_0 : i32, i32
  }
  func.func @transform_3(%arg0: i32, %arg1: i32) -> (i32, i32) {
    %c0_i32 = arith.constant 0 : i32
    %c0_i32_0 = arith.constant 0 : i32
    %c0_i32_1 = arith.constant 0 : i32
    return %c0_i32, %c0_i32_0 : i32, i32
  }
  func.func @transform_4(%arg0: i32, %arg1: i32) -> (i32, i32) {
    %c0_i32 = arith.constant 0 : i32
    %c0_i32_0 = arith.constant 0 : i32
    return %arg0, %c0_i32 : i32, i32
  }
}

</mosaic_0001>

<bundles_post_ra>
// kernel: tpu_custom_call.1
= control target key start
LH: loop header
LB: loop body
LE: loop exit
PB: predicated region body
PF: predicated region fallthrough
CT: control target
= control target key end

     0   :  { %9 = vsyncpa [#allocation4], 0  ;;  %s806_s0 = inlined_call_operand.hbm [shape: f32[2,24], index: 0, kind: input, shape index: {}]   ;;  %s807_s1 = inlined_call_operand.hbm [shape: f32[24,32], index: 1, kind: input, shape index: {}]   ;;  %s808_s2 = inlined_call_operand.vmem [shape: f32[1,32], index: 2, kind: input, shape index: {}]   ;;  %s809_s3 = inlined_call_operand.vmem [shape: f32[1,32], index: 3, kind: input, shape index: {}]   ;;  %s810_s4 = inlined_call_operand.hbm [shape: f32[2,32], index: 4, kind: output, shape index: {}]  }
   0x1   :  { %10 = vsyncpa [#allocation7], 0 }
   0x2   :  { %11 = vsyncpa [#allocation5], 0  ;;  %s725_s15 = smov [#allocation3]   ;;  %s726_s17 = smov [#allocation6]  }
   0x3   :  { %s18_s16 = sshll.u32 %s725_s15, 4  ;;  %s27_s18 = sshll.u32 %s726_s17, 4  ;;  %s19_s16 = int_to_ptr.vmem [resolvable:$true] %s18_s16  ;;  %s28_s18 = int_to_ptr.vmem [resolvable:$true] %s27_s18 }
   0x4   :  { %s667_s19 = scalar_lea.vmem %s19_s16, 32  ;;  %p672_p1 = scmp.lt.s32.totalorder %s19_s16, %s19_s16 }
   0x5   :  { %p668_p0 = scmp.ne.s32.totalorder %s19_s16, %s667_s19  ;;  %p673_p2 = scmp.lt.s32.totalorder %s667_s19, %s667_s19 }
   0x7   :  { %p674_p3 = por %p673_p2, %p672_p1 }
   0x9   :  { %p675_p4 = pnand %p674_p3, %p668_p0 }
   0xb   :  { %678 = shalt.err (!%p675_p4)
}
   0xc   :  { %21 = dma.hbm_to_vmem [thread:$0]  %s806_s0, 32, %s19_s16, [#allocation4]  }
   0xd   :  { %s687_s22 = scalar_lea.vmem %s28_s18, 384  ;;  %p692_p6 = scmp.lt.s32.totalorder %s28_s18, %s28_s18 }
   0xe   :  { %p688_p5 = scmp.ne.s32.totalorder %s28_s18, %s687_s22  ;;  %p693_p7 = scmp.lt.s32.totalorder %s687_s22, %s687_s22 }
  0x10   :  { %p694_p8 = por %p693_p7, %p692_p6 }
  0x12   :  { %p695_p9 = pnand %p694_p8, %p688_p5 }
  0x14   :  { %698 = shalt.err (!%p695_p9)
}
  0x15   :  { %s727_s23 = smov 128   ;;  %s728_s24 = smov 8  }
  0x16   :  { %33 = dma.hbm_to_vmem [thread:$0]  %s807_s1, 384, %s28_s18, [#allocation7], %s727_s23, %s727_s23, %s728_s24  }
  0x17   :  { %719 = dma.done.wait [#allocation4], 32  }
  0x18   :  { %720 = vsyncadd [#allocation4], 4294967264 }
  0x19   :  { %721 = dma.done.wait [#allocation7], 384  }
  0x1a   :  { %722 = vsyncadd [#allocation7], 4294966912  ;;  %v729_v0 = vmov 0.0   ;;  %vm730_vm0 = vmmov 0   ;;  %vm55_vm1 = vcmask 195584   ;;  %v54_v1 = vld [vmem:[#allocation6 + $0x10] sm:$0xff] }
  0x1b   :  { %598 = vmatprep.subr.mxu0 %v729_v0  ;;  %607 = vmatprep.subr.mxu1 %v729_v0  ;;  %v53_v2 = vld [vmem:[#allocation6 + $0x8] sm:$0xff]  ;;  %v52_v3 = vld [vmem:[#allocation6] sm:$0xff]  ;;  %v86_v4 = vand.u32 4294901760, %v54_v1  ;;  %v51_v7 = vld [vmem:[#allocation3] sm:$0x3]  ;;  %vm48_vm2 = vcmask 254976  }
  0x1c   :  { %604 = vmatprep.mubr.msk.f32.mxu0 %vm730_vm0, %v729_v0  ;;  %613 = vmatprep.mubr.msk.f32.mxu1 %vm730_vm0, %v729_v0  ;;  %v89_v5 = vand.u32 4294901760, %v53_v2  ;;  %v92_v6 = vand.u32 4294901760, %v52_v3  ;;  %v57_v8 = vsel %vm55_vm1, %v51_v7, 0  ;;  %49 = vst.msk [vmem:[#allocation2] sm:$0x3] %vm48_vm2, %v729_v0  ;;  %s731_s29 = smov [#allocation8]  }
  0x1d   :  { %599 = vmatpush3.msra.mxu0 %v86_v4  ;;  %v165_v9 = vsub.f32 %v54_v1, %v86_v4  ;;  %v127_v10 = vand.u32 4294901760, %v57_v8  ;;  %v572_v45 = vld [vmem:[%s808_s2] ss:$0 sm:$0xff]  ;;  %s562_s30 = sshll.u32 %s731_s29, 4  ;;  %s563_s30 = int_to_ptr.vmem [resolvable:$true] %s562_s30 }
  0x1e   :  { %v172_v11 = vsub.f32 %v53_v2, %v89_v5  ;;  %v179_v12 = vsub.f32 %v52_v3, %v92_v6  ;;  %600 = vmatprep.subr.mxu0 %v729_v0  ;;  %v573_v47 = vld [vmem:[%s809_s3] ss:$0 sm:$0xff]  ;;  %s699_s5 = scalar_lea.vmem %s563_s30, 32  ;;  %p704_p11 = scmp.lt.s32.totalorder %s563_s30, %s563_s30 }
  0x1f   :  { %601 = vmatpush3.msra.mxu0 %v89_v5  ;;  %v166_v13 = vand.u32 4294901760, %v165_v9  ;;  %v128_v14 = vsub.f32 %v57_v8, %v127_v10  ;;  %p700_p10 = scmp.ne.s32.totalorder %s563_s30, %s699_s5  ;;  %p705_p12 = scmp.lt.s32.totalorder %s699_s5, %s699_s5 }
  0x20   :  { %v173_v15 = vand.u32 4294901760, %v172_v11  ;;  %v180_v16 = vand.u32 4294901760, %v179_v12  ;;  %602 = vmatprep.subr.mxu0 %v729_v0 }
  0x21   :  { %603 = vmatpush3.msra.mxu0 %v92_v6  ;;  %v167_v17 = vsub.f32 %v165_v9, %v166_v13  ;;  %v129_v18 = vand.u32 4294901760, %v128_v14  ;;  %p706_p13 = por %p705_p12, %p704_p11 }
  0x22   :  { %v174_v19 = vsub.f32 %v172_v11, %v173_v15  ;;  %v181_v20 = vsub.f32 %v179_v12, %v180_v16  ;;  %616 = vmatprep.subr.mxu0 %v729_v0 }
  0x23   :  { %v168_v21 = vand.u32 4294901760, %v167_v17  ;;  %v130_v22 = vsub.f32 %v128_v14, %v129_v18  ;;  %v50_v40 = vld [vmem:[#allocation2] sm:$0x3]  ;;  %p707_p0 = pnand %p706_p13, %p700_p10 }
  0x24   :  { %v175_v23 = vand.u32 4294901760, %v174_v19  ;;  %v182_v25 = vand.u32 4294901760, %v181_v20 }
  0x25   :  { %608 = vmatpush3.msra.mxu1 %v168_v21  ;;  %v131_v24 = vand.u32 4294901760, %v130_v22 }
  0x26   :  { %609 = vmatprep.subr.mxu1 %v729_v0 }
  0x27   :  { %605 = vmatmul.mubr.f32.vlgmr.msra.gmra.mxu0 %v131_v24  ;;  %610 = vmatpush3.msra.mxu1 %v175_v23 }
  0x28   :  { %617 = vmatpush3.msra.mxu0 %v165_v9  ;;  %611 = vmatprep.subr.mxu1 %v729_v0 }
  0x29   :  { %618 = vmatprep.subr.mxu0 %v729_v0  ;;  %612 = vmatpush3.msra.mxu1 %v182_v25 }
  0x2a   :  { %619 = vmatpush3.msra.mxu0 %v172_v11  ;;  %614 = vmatmul.mubr.f32.vlgmr.msra.gmra.mxu1 %v127_v10 }
  0x2b   :  { %620 = vmatprep.subr.mxu0 %v729_v0  ;;  %625 = vmatprep.subr.mxu1 %v729_v0 }
  0x2c   :  { %621 = vmatpush3.msra.mxu0 %v179_v12  ;;  %622 = vmatprep.mubr.msk.f32.mxu0 %vm730_vm0, %v729_v0 }
  0x2d   :  { %626 = vmatpush3.msra.mxu1 %v86_v4  ;;  %623 = vmatmul.mubr.f32.vlgmr.msra.gmra.mxu0 %v128_v14 }
  0x2e   :  { %627 = vmatprep.subr.mxu1 %v729_v0  ;;  %634 = vmatprep.subr.mxu0 %v729_v0 }
  0x2f   :  { %628 = vmatpush3.msra.mxu1 %v89_v5  ;;  %635 = vmatpush3.msra.mxu0 %v166_v13 }
  0x30   :  { %629 = vmatprep.subr.mxu1 %v729_v0  ;;  %636 = vmatprep.subr.mxu0 %v729_v0 }
  0x31   :  { %630 = vmatpush3.msra.mxu1 %v92_v6  ;;  %631 = vmatprep.mubr.msk.f32.mxu1 %vm730_vm0, %v729_v0 }
  0x32   :  { %637 = vmatpush3.msra.mxu0 %v173_v15  ;;  %632 = vmatmul.mubr.f32.vlgmr.msra.gmra.mxu1 %v129_v18 }
  0x33   :  { %638 = vmatprep.subr.mxu0 %v729_v0  ;;  %643 = vmatprep.subr.mxu1 %v729_v0 }
  0x34   :  { %639 = vmatpush3.msra.mxu0 %v180_v16  ;;  %640 = vmatprep.mubr.msk.f32.mxu0 %vm730_vm0, %v729_v0 }
  0x35   :  { %644 = vmatpush3.msra.mxu1 %v86_v4  ;;  %641 = vmatmul.mubr.f32.vlgmr.msra.gmra.mxu0 %v127_v10 }
  0x36   :  { %645 = vmatprep.subr.mxu1 %v729_v0  ;;  %649 = vmatprep.mubr.msk.f32.mxu1 %vm730_vm0, %v729_v0 }
  0x37   :  { %646 = vmatpush3.msra.mxu1 %v89_v5 }
  0x38   :  { %647 = vmatprep.subr.mxu1 %v729_v0 }
  0x39   :  { %648 = vmatpush3.msra.mxu1 %v92_v6 }
  0x3a   :  { %650 = vmatmul.mubr.f32.vlgmr.msra.gmra.mxu1 %v127_v10 }
  0xe7   :  { %v133_v26 = vpop.f32.mrf.mxu0 }
  0xe9   :  { %v606_v27 = vpop.f32.mrf.mxu0 }
  0xea   :  { %v219_v28 = vpop.f32.mrf.mxu1 }
  0xeb   :  { %v220_v31 = vadd.f32 %v219_v28, %v133_v26 }
  0xec   :  { %v615_v29 = vpop.f32.mrf.mxu1 }
  0xed   :  { %v297_v30 = vpop.f32.mrf.mxu0 }
  0xee   :  { %v298_v34 = vadd.f32 %v297_v30, %v220_v31 }
  0xef   :  { %v624_v32 = vpop.f32.mrf.mxu0 }
  0xf2   :  { %v373_v33 = vpop.f32.mrf.mxu1 }
  0xf3   :  { %v374_v36 = vadd.f32 %v373_v33, %v298_v34 }
  0xf4   :  { %v633_v35 = vpop.f32.mrf.mxu1 }
  0xf5   :  { %v453_v37 = vpop.f32.mrf.mxu0 }
  0xf6   :  { %v454_v39 = vadd.f32 %v453_v37, %v374_v36 }
  0xf7   :  { %v642_v38 = vpop.f32.mrf.mxu0 }
  0xfa   :  { %v527_v41 = vpop.f32.mrf.mxu1 }
  0xfb   :  { %v528_v42 = vadd.f32 %v527_v41, %v454_v39 }
  0xfc   :  { %v651_v43 = vpop.f32.mrf.mxu1 }
  0xfd   :  { %v531_v44 = vadd.f32 %v528_v42, %v50_v40 }
  0xff   :  { %533 = vst.msk [vmem:[#allocation2] sm:$0x3] %vm48_vm2, %v531_v44 }
 0x106   :  { %v537_v46 = vld [vmem:[#allocation2] sm:$0x3] }
 0x107   :  { %v545_v48 = vmul.f32 %v572_v45, %v537_v46 }
 0x109   :  { %v553_v49 = vadd.f32 %v573_v47, %v545_v48 }
 0x10b   :  { %v554_v50 = vmax.f32 %v553_v49, 0.0 }
 0x10d   :  { %555 = vst.msk [vmem:[#allocation8] sm:$0x3] %vm48_vm2, %v554_v50 }
 0x10e   :  { %710 = shalt.err (!%p707_p0)
}
 0x10f   :  { %565 = dma.vmem_to_hbm [thread:$0]  %s563_s30, 32, %s810_s4, [#allocation5]  }
 0x110   :  { %723 = dma.done.wait [#allocation5], 32  }
 0x111   :  { %724 = vsyncadd [#allocation5], 4294967264 }
 0x112   :  { %569 = vsyncpa [#allocation4], 1 }
 0x113   :  { %570 = vsyncpa [#allocation7], 1 }
 0x114   :  { %571 = vsyncpa [#allocation5], 1 }

</bundles_post_ra>
